<compile_context>
chip_gen: v5e
topology: v5e:2x2
jax: 0.10.0
libtpu: 0.0.40
codegen_flags: <defaults>
</compile_context>

<pallas_src>
import jax
import jax.numpy as jnp
from jax.experimental import pallas as pl
from jax.experimental.pallas import tpu as pltpu


def _round_up(x, m):
    return (x + m - 1) // m * m


def to_2tuple(v):
    return (v, v) if isinstance(v, int) else tuple(v)


# ---------------------------------------------------------------------------
# Pallas kernel: one row tile of  (N, K) @ (K, E) + bias  ->  (N, E)
# ---------------------------------------------------------------------------
def _proj_kernel(x_ref, w_ref, b_ref, o_ref):
    # bf16 x bf16 -> f32 accumulation on the MXU, f32 bias add, bf16 store.
    acc = jnp.dot(x_ref[...], w_ref[...], preferred_element_type=jnp.float32)
    o_ref[...] = (acc + b_ref[...]).astype(o_ref.dtype)


def _proj_matmul(x_mat_bf16, w_mat_bf16, bias_f32, *, tm):
    """x_mat: (N, Kp) bf16, w_mat: (Kp, Ep) bf16, bias: (1, Ep) f32 -> (N, Ep) bf16.

    Ep must be a multiple of 128.  N may be ragged w.r.t. `tm`: the last grid
    step is clipped/masked by Pallas, which is safe because each output row
    depends only on its own input row.  Weight / bias index_maps are constant
    so those blocks stay VMEM-resident across the whole grid.
    """
    N, Kp = x_mat_bf16.shape
    Ep = w_mat_bf16.shape[1]
    assert Ep % 128 == 0

    grid = (pl.cdiv(N, tm),)
    cost = pl.CostEstimate(
        flops=2 * N * Kp * Ep,
        transcendentals=0,
        bytes_accessed=N * Kp * 2 + Kp * Ep * 2 + Ep * 4 + N * Ep * 2,
    )
    # NOTE: on tight-VMEM parts (v7x 64 MiB) the constant-index weight/bias
    # blocks could additionally use pipeline_mode=pl.Buffered(1) to drop their
    # redundant second buffer (~2 MiB at SMPLest-X sizes); left at the default
    # here for maximum lowering robustness.
    return pl.pallas_call(
        _proj_kernel,
        out_shape=jax.ShapeDtypeStruct((N, Ep), jnp.bfloat16),
        grid_spec=pltpu.PrefetchScalarGridSpec(
            num_scalar_prefetch=0,
            grid=grid,
            in_specs=[
                pl.BlockSpec((tm, Kp), lambda i: (i, 0)),   # row tile, pipelined
                pl.BlockSpec((Kp, Ep), lambda i: (0, 0)),   # weight, resident
                pl.BlockSpec((1, Ep), lambda i: (0, 0)),    # bias, resident
            ],
            out_specs=pl.BlockSpec((tm, Ep), lambda i: (i, 0)),
        ),
        compiler_params=pltpu.CompilerParams(
            dimension_semantics=("parallel",),   # shard row tiles across TCs
        ),
        cost_estimate=cost,
    )(x_mat_bf16, w_mat_bf16, bias_f32)


# ---------------------------------------------------------------------------
# PatchEmbed module (parameters + forward) in JAX
# ---------------------------------------------------------------------------
class PatchEmbed:
    """Image to Patch Embedding (Pallas-backed conv projection)."""

    def __init__(self, img_size=224, patch_size=16, in_chans=3, embed_dim=768,
                 ratio=1, key=None):
        img_size = to_2tuple(img_size)
        patch_size = to_2tuple(patch_size)
        num_patches = (img_size[1] // patch_size[1]) * (img_size[0] // patch_size[0]) * ratio ** 2
        self.patch_shape = (int(img_size[0] // patch_size[0] * ratio),
                            int(img_size[1] // patch_size[1] * ratio))
        self.origin_patch_shape = (int(img_size[0] // patch_size[0]),
                                   int(img_size[1] // patch_size[1]))
        self.img_size = img_size
        self.patch_size = patch_size
        self.num_patches = num_patches
        self.in_chans = in_chans
        self.embed_dim = embed_dim
        self.stride = patch_size[0] // ratio
        self.padding = 4 + 2 * (ratio // 2 - 1)

        # Deterministic parameter init (synthetic weights, no checkpoint load).
        if key is None:
            key = jax.random.PRNGKey(0)
        kw, kb = jax.random.split(key)
        fan_in = in_chans * patch_size[0] * patch_size[1]
        bound = 1.0 / (fan_in ** 0.5)
        # Conv2d weight: (embed_dim, in_chans, KH, KW), bias: (embed_dim,)
        self.weight = jax.random.uniform(
            kw, (embed_dim, in_chans, patch_size[0], patch_size[1]),
            dtype=jnp.float32, minval=-bound, maxval=bound)
        self.bias = jax.random.uniform(
            kb, (embed_dim,), dtype=jnp.float32, minval=-bound, maxval=bound)

        # --- precompute kernel-ready projection weights once ---------------
        self._K = fan_in                                     # C*KH*KW
        self._K_pad = _round_up(self._K, 128)                # lane-dense MXU feed
        self._E_pad = _round_up(embed_dim, 128)              # lane-dense stores
        w_mat = self.weight.reshape(embed_dim, self._K).T    # (K, E), (c,kh,kw)-major
        self._w_mat_bf16 = jnp.pad(
            w_mat, ((0, self._K_pad - self._K), (0, self._E_pad - embed_dim)),
        ).astype(jnp.bfloat16)
        self._b_mat_f32 = jnp.pad(
            self.bias, (0, self._E_pad - embed_dim)).reshape(1, self._E_pad)

    # -----------------------------------------------------------------------
    def _extract_patches_bf16(self, x, Hp, Wp):
        """(B, C, H, W) f32 -> (B*Hp*Wp, Kp) bf16, (c, kh, kw)-major K ordering."""
        B, C, H, W = x.shape
        KH, KW = self.patch_size
        s, p = self.stride, self.padding

        # Cast BEFORE pad/crop/transpose so the im2col glue moves half the bytes.
        xb = x.astype(jnp.bfloat16)
        xp = jnp.pad(xb, ((0, 0), (0, 0), (p, p), (p, p)))

        if s == KH and s == KW:
            # Non-overlapping patches (ratio == 1): crop + reshape + transpose.
            # TODO(synk): fuse this extraction into the Pallas kernel via a
            # band-of-patch-rows BlockSpec over the padded NCHW image to drop
            # the HBM-materialized (N, K) matrix entirely.
            xc = xp[:, :, :Hp * KH, :Wp * KW]
            col = xc.reshape(B, C, Hp, KH, Wp, KW)
            col = col.transpose(0, 2, 4, 1, 3, 5)            # (B, Hp, Wp, C, KH, KW)
            x_mat = col.reshape(B * Hp * Wp, C * KH * KW)
        else:
            # Overlapping patches (ratio > 1): strided-slice stack fallback.
            cols = []
            for ph in range(KH):
                for pw in range(KW):
                    cols.append(xp[:, :, ph:ph + s * Hp:s, pw:pw + s * Wp:s])
            col = jnp.stack(cols, axis=2)                    # (B, C, KH*KW, Hp, Wp)
            col = col.reshape(B, C * KH * KW, Hp, Wp)
            x_mat = col.transpose(0, 2, 3, 1).reshape(B * Hp * Wp, C * KH * KW)

        if self._K_pad > self._K:
            x_mat = jnp.pad(x_mat, ((0, 0), (0, self._K_pad - self._K)))
        return x_mat

    # -----------------------------------------------------------------------
    def __call__(self, x):
        # x: (B, C, H, W) float32 -> ((B, Hp*Wp, embed_dim) bfloat16, (Hp, Wp))
        B, C, H, W = x.shape
        KH, KW = self.patch_size
        s, p = self.stride, self.padding

        Hp = (H + 2 * p - KH) // s + 1
        Wp = (W + 2 * p - KW) // s + 1

        x_mat = self._extract_patches_bf16(x, Hp, Wp)        # (N, Kp) bf16
        N = x_mat.shape[0]

        # Row tile: multiple of 16 (bf16 sublane packing); ragged last tile is
        # handled by the cdiv grid (no padded copy, no post-kernel row slice).
        # 512 fits v5e's 16 MiB scoped-VMEM default with margin.
        TM = min(512, _round_up(N, 16))

        # --- hot path in Pallas: bf16 patches @ W + f32 bias on the MXU -----
        out = _proj_matmul(x_mat, self._w_mat_bf16, self._b_mat_f32, tm=TM)

        # Strip E padding only when embed_dim is not already 128-aligned.
        if self._E_pad != self.embed_dim:
            out = out[:, :self.embed_dim]
        # Equivalent of PyTorch's x.flatten(2).transpose(1, 2).
        out = out.reshape(B, Hp * Wp, self.embed_dim)
        return out, (Hp, Wp)


# ---------------------------------------------------------------------------
# Reference (pure lax conv) for a numerical sanity check
# ---------------------------------------------------------------------------
def reference_forward(module, x):
    y = jax.lax.conv_general_dilated(
        x, module.weight,
        window_strides=(module.stride, module.stride),
        padding=[(module.padding, module.padding)] * 2,
        dimension_numbers=("NCHW", "OIHW", "NCHW"))
    y = y + module.bias.reshape(1, -1, 1, 1)
    B, E, Hp, Wp = y.shape
    y = y.reshape(B, E, Hp * Wp).transpose(0, 2, 1)
    return y, (Hp, Wp)


if __name__ == "__main__":
    # Small shapes consistent with the module:
    #   img_size=16, patch_size=8, in_chans=4, embed_dim=32, ratio=1
    #   -> conv padding = 2, stride = 8, Hp = Wp = 2
    B, C, H, W = 2, 4, 16, 16
    module = PatchEmbed(img_size=16, patch_size=8, in_chans=4, embed_dim=32,
                        ratio=1, key=jax.random.PRNGKey(42))

    x = jax.random.normal(jax.random.PRNGKey(0), (B, C, H, W), dtype=jnp.float32)

    out, (Hp, Wp) = module(x)
    out = jax.block_until_ready(out)

    ref, (Hp_ref, Wp_ref) = reference_forward(module, x)
    assert (Hp, Wp) == (Hp_ref, Wp_ref), ((Hp, Wp), (Hp_ref, Wp_ref))
    assert out.shape == (B, Hp * Wp, module.embed_dim), out.shape
    assert out.dtype == jnp.bfloat16, out.dtype
    # bf16 inputs/weights/output (f32 accumulation) -> loosened tolerance vs f32 ref.
    err = float(jnp.max(jnp.abs(out.astype(jnp.float32) - ref)))
    assert err < 5e-2, err

    print("KERNEL_OK")
</pallas_src>

<mosaic_0001>
module attributes {stable_mosaic.version = 11 : i64} {
  func.func @_proj_kernel(%arg0: i32, %arg1: memref<16x256xbf16, #tpu.memory_space<vmem>>, %arg2: memref<256x128xbf16, #tpu.memory_space<vmem>>, %arg3: memref<1x128xf32, #tpu.memory_space<vmem>>, %arg4: memref<16x128xbf16, #tpu.memory_space<vmem>>) attributes {dimension_semantics = [#tpu.dimension_semantics<parallel>], iteration_bounds = array<i64: 1>, scalar_prefetch = 0 : i64, scratch_operands = 0 : i64, tpu.core_type = #tpu.core_type<tc>, window_params = [{transform_indices = @transform_0, window_bounds = array<i64: 16, 256>}, {pipeline_mode = #tpu.pipeline_mode<synchronous>, transform_indices = @transform_1, window_bounds = array<i64: 256, 128>}, {pipeline_mode = #tpu.pipeline_mode<synchronous>, transform_indices = @transform_2, window_bounds = array<i64: 1, 128>}, {transform_indices = @transform_3, window_bounds = array<i64: 16, 128>}]} {
    %c0 = arith.constant 0 : index
    %c0_0 = arith.constant 0 : index
    %0 = vector.load %arg1[%c0, %c0_0] : memref<16x256xbf16, #tpu.memory_space<vmem>>, vector<16x256xbf16>
    %c0_1 = arith.constant 0 : index
    %c0_2 = arith.constant 0 : index
    %1 = vector.load %arg2[%c0_1, %c0_2] : memref<256x128xbf16, #tpu.memory_space<vmem>>, vector<256x128xbf16>
    %cst = arith.constant dense<0.000000e+00> : vector<16x128xf32>
    %2 = tpu.matmul %0, %1, %cst {dimension_numbers = #tpu.dot_dimension_numbers<[1], [0], [0], [1], [0, 0, 1, 1], [], []>} : vector<16x256xbf16>, vector<256x128xbf16>, vector<16x128xf32> -> vector<16x128xf32>
    %c0_3 = arith.constant 0 : index
    %c0_4 = arith.constant 0 : index
    %3 = vector.load %arg3[%c0_3, %c0_4] : memref<1x128xf32, #tpu.memory_space<vmem>>, vector<1x128xf32>
    %4 = vector.broadcast %3 : vector<1x128xf32> to vector<16x128xf32>
    %5 = arith.addf %2, %4 : vector<16x128xf32>
    %6 = arith.truncf %5 : vector<16x128xf32> to vector<16x128xbf16>
    %c0_5 = arith.constant 0 : index
    %c0_6 = arith.constant 0 : index
    %7 = vector.load %arg4[%c0_5, %c0_6] : memref<16x128xbf16, #tpu.memory_space<vmem>>, vector<16x128xbf16>
    tpu.vector_store %arg4[%c0_5, %c0_6], %6 {strides = array<i32>} : memref<16x128xbf16, #tpu.memory_space<vmem>>, vector<16x128xbf16>,
    return
  }
  func.func @transform_0(%arg0: i32) -> (i32, i32) {
    %c0_i32 = arith.constant 0 : i32
    %c0_i32_0 = arith.constant 0 : i32
    return %arg0, %c0_i32 : i32, i32
  }
  func.func @transform_1(%arg0: i32) -> (i32, i32) {
    %c0_i32 = arith.constant 0 : i32
    %c0_i32_0 = arith.constant 0 : i32
    %c0_i32_1 = arith.constant 0 : i32
    return %c0_i32, %c0_i32_0 : i32, i32
  }
  func.func @transform_2(%arg0: i32) -> (i32, i32) {
    %c0_i32 = arith.constant 0 : i32
    %c0_i32_0 = arith.constant 0 : i32
    %c0_i32_1 = arith.constant 0 : i32
    return %c0_i32, %c0_i32_0 : i32, i32
  }
  func.func @transform_3(%arg0: i32) -> (i32, i32) {
    %c0_i32 = arith.constant 0 : i32
    %c0_i32_0 = arith.constant 0 : i32
    return %arg0, %c0_i32 : i32, i32
  }
}

</mosaic_0001>

<bundles_post_ra>
// kernel: tpu_custom_call.1
= control target key start
LH: loop header
LB: loop body
LE: loop exit
PB: predicated region body
PF: predicated region fallthrough
CT: control target
= control target key end

     0   :  { %8 = vsyncpa [#allocation3], 0  ;;  %s469_s0 = inlined_call_operand.hbm [shape: bf16[8,256], index: 0, kind: input, shape index: {}]   ;;  %s470_s1 = inlined_call_operand.hbm [shape: bf16[256,128], index: 1, kind: input, shape index: {}]   ;;  %s471_s2 = inlined_call_operand.vmem [shape: f32[1,128], index: 2, kind: input, shape index: {}]   ;;  %s472_s3 = inlined_call_operand.hbm [shape: bf16[8,128], index: 3, kind: output, shape index: {}]  }
   0x1   :  { %9 = vsyncpa [#allocation6], 0 }
   0x2   :  { %10 = vsyncpa [#allocation4], 0 }
   0x3   :  { %14 = vsyncadd [#allocation3], 128  ;;  %s15_s14 = sshll.u32 %s469_s0, 4  ;;  %s424_s15 = smov [#allocation2]   ;;  %s16_s14 = int_to_ptr.hbm [resolvable:$true] %s15_s14 }
   0x4   :  { %s17_s16 = sshll.u32 %s424_s15, 4  ;;  %s28_s19 = sshll.u32 %s470_s1, 4  ;;  %s18_s16 = int_to_ptr.vmem [resolvable:$true] %s17_s16  ;;  %s29_s19 = int_to_ptr.hbm [resolvable:$true] %s28_s19 }
   0x5   :  { %s425_s20 = smov 128   ;;  %s426_s21 = smov 8  }
   0x6   :  { %23 = dma.hbm_to_vmem [thread:$0]  %s16_s14, 128, %s18_s16, [#allocation3], %s425_s20, %s425_s20, %s426_s21  }
   0x7   :  { %s427_s22 = smov [#allocation5]   ;;  %s428_s24 = smov 64  }
   0x8   :  { %s30_s23 = sshll.u32 %s427_s22, 4  ;;  %s429_s25 = smov 4   ;;  %s31_s23 = int_to_ptr.vmem [resolvable:$true] %s30_s23 }
   0x9   :  { %36 = dma.hbm_to_vmem [thread:$0]  %s29_s19, 2048, %s31_s23, [#allocation6], %s428_s24, %s428_s24, %s429_s25  }
   0xa   :  { %418 = dma.done.wait [#allocation3], 256  }
   0xb   :  { %419 = vsyncadd [#allocation3], 4294967040 }
   0xc   :  { %420 = dma.done.wait [#allocation6], 2048  }
   0xd   :  { %421 = vsyncadd [#allocation6], 4294965248  ;;  %v324_v0 = vld [vmem:[#allocation5 + $0x38] sm:$0xff]  ;;  %v323_v2 = vld [vmem:[#allocation5 + $0x30] sm:$0xff] }
   0xe   :  { %v332_v1 = vld [vmem:[#allocation5 + $0x78] sm:$0xff]  ;;  %191 = vmatpush.bf16.msra.mxu0 %v324_v0  ;;  %v331_v3 = vld [vmem:[#allocation5 + $0x70] sm:$0xff]  ;;  %v322_v4 = vld [vmem:[#allocation5 + $0x28] sm:$0xff] }
   0xf   :  { %205 = vmatpush.bf16.msra.mxu1 %v332_v1  ;;  %v330_v5 = vld [vmem:[#allocation5 + $0x68] sm:$0xff]  ;;  %v321_v6 = vld [vmem:[#allocation5 + $0x20] sm:$0xff]  ;;  %v320_v8 = vld [vmem:[#allocation5 + $0x18] sm:$0xff] }
  0x10   :  { %v329_v7 = vld [vmem:[#allocation5 + $0x60] sm:$0xff]  ;;  %v328_v9 = vld [vmem:[#allocation5 + $0x58] sm:$0xff]  ;;  %v319_v10 = vld [vmem:[#allocation5 + $0x10] sm:$0xff] }
  0x11   :  { %v327_v11 = vld [vmem:[#allocation5 + $0x50] sm:$0xff]  ;;  %v318_v12 = vld [vmem:[#allocation5 + $0x8] sm:$0xff]  ;;  %v317_v14 = vld [vmem:[#allocation5] sm:$0xff] }
  0x12   :  { %192 = vmatpush.bf16.msra.mxu0 %v323_v2  ;;  %v326_v13 = vld [vmem:[#allocation5 + $0x48] sm:$0xff]  ;;  %v325_v15 = vld [vmem:[#allocation5 + $0x40] sm:$0xff]  ;;  %v245_v16 = vld [vmem:[#allocation2] sm:$0xf] }
  0x13   :  { %206 = vmatpush.bf16.msra.mxu1 %v331_v3  ;;  %v316_v17 = vld [vmem:[#allocation2 + $0x4] sm:$0xf0]  ;;  %v315_v18 = vld [vmem:[#allocation2 + $0x4] sm:$0xf]  ;;  %v247_v19 = vld [vmem:[#allocation2 + $0x8] sm:$0xf0] }
  0x14   :  { %v246_v20 = vor.u32 %v316_v17, %v245_v16  ;;  %v250_v21 = vor.u32 %v315_v18, %v247_v19  ;;  %v345_v24 = vld [vmem:[%s471_s2] ss:$0 sm:$0xff] }
  0x16   :  { %193 = vmatpush.bf16.msra.mxu0 %v322_v4 }
  0x17   :  { %207 = vmatpush.bf16.msra.mxu1 %v330_v5 }
  0x1a   :  { %194 = vmatpush.bf16.msra.mxu0 %v321_v6 }
  0x1b   :  { %208 = vmatpush.bf16.msra.mxu1 %v329_v7 }
  0x1e   :  { %195 = vmatpush.bf16.msra.mxu0 %v320_v8 }
  0x1f   :  { %209 = vmatpush.bf16.msra.mxu1 %v328_v9 }
  0x22   :  { %196 = vmatpush.bf16.msra.mxu0 %v319_v10 }
  0x23   :  { %210 = vmatpush.bf16.msra.mxu1 %v327_v11 }
  0x26   :  { %197 = vmatpush.bf16.msra.mxu0 %v318_v12 }
  0x27   :  { %211 = vmatpush.bf16.msra.mxu1 %v326_v13 }
  0x2a   :  { %198 = vmatpush.bf16.msra.mxu0 %v317_v14 }
  0x2b   :  { %212 = vmatpush.bf16.msra.mxu1 %v325_v15 }
  0x2d   :  { %199 = vmatmul.bf16.vlgmr.msra.gmra.mxu0 %v246_v20 }
  0x2e   :  { %213 = vmatmul.bf16.vlgmr.msra.gmra.mxu1 %v250_v21 }
  0xaa   :  { %v200_v22 = vpop.f32.mrf.mxu0 }
  0xab   :  { %v214_v23 = vpop.f32.mrf.mxu1  ;;  %v201_v25 = vadd.f32 %v345_v24, %v200_v22 }
  0xad   :  { %v215_v29 = vadd.f32 %v214_v23, %v201_v25 }
  0xb2   :  { %v202_v26 = vpop.f32.mrf.mxu0 }
  0xb3   :  { %v203_v27 = vadd.f32 %v345_v24, %v202_v26  ;;  %v216_v28 = vpop.f32.mrf.mxu1 }
  0xb5   :  { %v217_v30 = vadd.f32 %v216_v28, %v203_v27 }
  0xb7   :  { %v336_v31 = vpack.c.bf16 %v217_v30, %v215_v29 }
  0xb9   :  { %337 = vst [vmem:[#allocation7] sm:$0xff] %v336_v31  }
  0xba   :  { %226 = vsyncadd [#allocation4], 64  ;;  %s229_s28 = sshll.u32 %s472_s3, 4  ;;  %s430_s29 = smov [#allocation7]   ;;  %s230_s28 = int_to_ptr.hbm [resolvable:$true] %s229_s28 }
  0xbb   :  { %s227_s30 = sshll.u32 %s430_s29, 4  ;;  %s228_s30 = int_to_ptr.vmem [resolvable:$true] %s227_s30 }
  0xbc   :  { %235 = dma.vmem_to_hbm [thread:$0]  %s228_s30, 64, %s230_s28, [#allocation4], %s428_s24, %s428_s24, %s429_s25  }
  0xbd   :  { %422 = dma.done.wait [#allocation4], 128  }
  0xbe   :  { %423 = vsyncadd [#allocation4], 4294967168 }
  0xbf   :  { %240 = vsyncpa [#allocation3], 1 }
  0xc0   :  { %241 = vsyncpa [#allocation6], 1 }
  0xc1   :  { %242 = vsyncpa [#allocation4], 1 }

</bundles_post_ra>
